<compile_context>
chip_gen: v6e
topology: v6e:2x2x1
jax: 0.10.0
libtpu: 0.0.40
codegen_flags: <defaults>
</compile_context>

<pallas_src>
import functools

import jax
import jax.numpy as jnp
from jax.experimental import pallas as pl
from jax.experimental.pallas import tpu as pltpu


def _round_up(n, m):
    return (n + m - 1) // m * m


def _gelu(h, approximate):
    if approximate:
        # tanh approximation: single EUP op on an otherwise idle slot (perf option).
        return jax.nn.gelu(h, approximate=True)
    # Exact GELU (matches torch.nn.GELU default): 0.5*x*(1+erf(x/sqrt(2)))
    return 0.5 * h * (1.0 + jax.lax.erf(h * 0.7071067811865476))


def _mlp_body(x_ref, w1_ref, b1_ref, w2_ref, approximate):
    """fc1 (f32 accumulation) -> +bias1 -> GELU -> fc2 partial (f32)."""
    h = jnp.dot(x_ref[...], w1_ref[...], preferred_element_type=jnp.float32)
    h = h + b1_ref[...].astype(jnp.float32)
    h = _gelu(h, approximate)
    # Dropout(p=0.0) is the identity -> no-op.
    # TODO(synk): stochastic dropout (p>0, training) would use pltpu.prng_random_bits.
    return jnp.dot(h.astype(w2_ref.dtype), w2_ref[...],
                   preferred_element_type=jnp.float32)


def _mlp_kernel_resident(x_ref, w1_ref, b1_ref, w2_ref, b2_ref, o_ref, *,
                         approximate):
    """Weights-resident fast path: full hidden per step, 1-D row grid, no scratch."""
    acc = _mlp_body(x_ref, w1_ref, b1_ref, w2_ref, approximate)
    o_ref[...] = (acc + b2_ref[...].astype(jnp.float32)).astype(o_ref.dtype)


def _mlp_kernel_chunked(x_ref, w1_ref, b1_ref, w2_ref, b2_ref, o_ref, *scratch,
                        approximate):
    """Hidden-chunked path: accumulate fc2 partials over the 'arbitrary' hidden axis."""
    # f32 outputs accumulate directly into o_ref (it is VMEM-resident across the
    # hidden axis); non-f32 outputs use an f32 VMEM scratch.
    acc_ref = scratch[0] if scratch else o_ref
    h_idx = pl.program_id(1)

    @pl.when(h_idx == 0)
    def _init():
        acc_ref[...] = jnp.zeros_like(acc_ref)

    acc_ref[...] += _mlp_body(x_ref, w1_ref, b1_ref, w2_ref, approximate)

    @pl.when(h_idx == pl.num_programs(1) - 1)
    def _finalize():
        o_ref[...] = (acc_ref[...] + b2_ref[...].astype(jnp.float32)
                      ).astype(o_ref.dtype)


def _vmem_budget_bytes():
    """Generation-aware usable VMEM budget (~80% of physical per TensorCore)."""
    cap = 64 * 1024 * 1024  # conservative fallback: v7x has 64 MiB per TC
    try:
        info = pltpu.get_tpu_info()
        cap = int(getattr(info, "vmem_capacity_bytes", cap))
    except Exception:
        pass
    return int(cap * 4 // 5)  # leave headroom for compiler scratch / semaphores


def _pad2d(a, rows, cols):
    if rows == 0 and cols == 0:
        return a  # elide the extra HBM pass when already aligned
    return jnp.pad(a, ((0, rows), (0, cols)))


@functools.partial(jax.jit, static_argnames=("block_rows", "block_hidden",
                                             "cast_to_bf16", "approximate_gelu"))
def mlp_pallas(x, w1, b1, w2, b2, *, block_rows=None, block_hidden=None,
               cast_to_bf16=True, approximate_gelu=False):
    """x: (..., in_features). w1: (in, hidden), w2: (hidden, out). Returns (..., out)."""
    in_features = x.shape[-1]
    hidden_features = w1.shape[1]
    out_features = w2.shape[1]

    lead_shape = x.shape[:-1]
    out_dtype = x.dtype
    x2d = x.reshape(-1, in_features)
    m = x2d.shape[0]

    # bf16 MXU operands (mixed precision); f32 accumulation stays in-kernel.
    if cast_to_bf16 and jnp.dtype(x.dtype) == jnp.dtype(jnp.float32):
        compute_dtype = jnp.bfloat16
    else:
        compute_dtype = x.dtype

    act_isz = jnp.dtype(compute_dtype).itemsize
    w_isz = jnp.dtype(compute_dtype).itemsize
    out_isz = jnp.dtype(out_dtype).itemsize

    # Lane-dense feature widths (multiples of 128).
    cp = _round_up(in_features, 128)
    cop = _round_up(out_features, 128)
    hp_full = _round_up(hidden_features, 128)

    budget = _vmem_budget_bytes()

    # Row tile: multiple of 8 sublanes; bigger tiles on big-VMEM (v5e/v6e) parts.
    if block_rows is None:
        block_rows = 1024 if budget >= (96 << 20) else 512
    bm = max(8, min(_round_up(block_rows, 8), _round_up(m, 8)))
    # Keep >= 2 row tiles so v7x's two TensorCores both get work on the "parallel"
    # axis (near-free extra grid step on single-TC chips).
    if m > 8 and _round_up(m, bm) // bm < 2:
        bm = max(8, _round_up((bm + 1) // 2, 8))
    mp = _round_up(m, bm)

    use_scratch = jnp.dtype(out_dtype) != jnp.dtype(jnp.float32)

    def resident_est(bm_):
        w_bytes = (cp * hp_full + hp_full + hp_full * cop + cop) * w_isz
        return (2 * (bm_ * cp * act_isz + bm_ * cop * out_isz)
                + 2 * w_bytes + bm_ * hp_full * 4)

    def chunked_est(bm_, bh_):
        w_bytes = (cp * bh_ + bh_ + bh_ * cop + cop) * w_isz
        return (2 * (bm_ * cp * act_isz + w_bytes + bm_ * cop * out_isz)
                + bm_ * bh_ * 4 + (bm_ * cop * 4 if use_scratch else 0))

    # Weights-resident fast path: 1-D row grid, constant weight index_maps
    # -> weights DMA'd from HBM exactly once.
    want_resident = (block_hidden is None) or (block_hidden >= hp_full)
    resident = want_resident and resident_est(bm) <= budget

    if resident:
        bh = hp_full
    else:
        bh0 = 512 if block_hidden is None else block_hidden
        bh = max(128, min(_round_up(bh0, 128), hp_full))
        while chunked_est(bm, bh) > budget and bh > 128:
            bh = max(128, _round_up(bh // 2, 128))
        while chunked_est(bm, bh) > budget and bm > 8:
            bm = max(8, _round_up(bm // 2, 8))
        mp = _round_up(m, bm)
    hp = _round_up(hidden_features, bh)

    # Zero padding is semantically inert: padded in-features contribute 0 to fc1,
    # padded hidden units give gelu(0)=0 against zero W2 rows, padded out-features
    # are sliced away below.
    # TODO(synk): mask the tail row tile in-kernel instead of padding mp for ragged m.
    xp = _pad2d(x2d.astype(compute_dtype), mp - m, cp - in_features)
    w1p = _pad2d(w1.astype(compute_dtype), cp - in_features, hp - hidden_features)
    b1p = _pad2d(b1.reshape(1, -1), 0, hp - hidden_features)
    w2p = _pad2d(w2.astype(compute_dtype), hp - hidden_features, cop - out_features)
    b2p = _pad2d(b2.reshape(1, -1), 0, cop - out_features)

    grid0 = mp // bm

    est = resident_est(bm) if resident else chunked_est(bm, bh)
    vmem_limit = int(min(budget, max(int(est * 5 // 4), 32 * 1024 * 1024)))

    # Cost estimate: count weight HBM bytes once (resident) or once per row tile
    # (re-streamed when the hidden axis is chunked).
    weight_hbm_bytes = ((w1p.size + w2p.size) * w_isz
                        + b1p.size * b1p.dtype.itemsize
                        + b2p.size * b2p.dtype.itemsize)
    if not resident:
        weight_hbm_bytes *= grid0
    cost = pl.CostEstimate(
        flops=2 * m * (in_features * hidden_features
                       + hidden_features * out_features),
        transcendentals=m * hidden_features,
        bytes_accessed=int(xp.size * act_isz + weight_hbm_bytes + mp * cop * out_isz),
    )

    if resident:
        grid = (grid0,)
        in_specs = [
            pl.BlockSpec((bm, cp), lambda i: (i, 0)),
            pl.BlockSpec((cp, bh), lambda i: (0, 0)),   # constant -> fetched once
            pl.BlockSpec((1, bh), lambda i: (0, 0)),
            pl.BlockSpec((bh, cop), lambda i: (0, 0)),
            pl.BlockSpec((1, cop), lambda i: (0, 0)),
        ]
        out_specs = pl.BlockSpec((bm, cop), lambda i: (i, 0))
        scratch_shapes = []
        kernel = functools.partial(_mlp_kernel_resident,
                                   approximate=approximate_gelu)
        dim_sem = ("parallel",)
    else:
        grid = (grid0, hp // bh)
        in_specs = [
            pl.BlockSpec((bm, cp), lambda i, h: (i, 0)),
            pl.BlockSpec((cp, bh), lambda i, h: (0, h)),
            pl.BlockSpec((1, bh), lambda i, h: (0, h)),
            pl.BlockSpec((bh, cop), lambda i, h: (h, 0)),
            pl.BlockSpec((1, cop), lambda i, h: (0, 0)),
        ]
        out_specs = pl.BlockSpec((bm, cop), lambda i, h: (i, 0))
        scratch_shapes = ([pltpu.VMEM((bm, cop), jnp.float32)]
                          if use_scratch else [])
        kernel = functools.partial(_mlp_kernel_chunked,
                                   approximate=approximate_gelu)
        dim_sem = ("parallel", "arbitrary")

    out = pl.pallas_call(
        kernel,
        out_shape=jax.ShapeDtypeStruct((mp, cop), out_dtype),
        grid_spec=pltpu.PrefetchScalarGridSpec(
            num_scalar_prefetch=0,
            grid=grid,
            in_specs=in_specs,
            out_specs=out_specs,
            scratch_shapes=scratch_shapes,
        ),
        compiler_params=pltpu.CompilerParams(
            dimension_semantics=dim_sem,
            vmem_limit_bytes=vmem_limit,
        ),
        cost_estimate=cost,
    )(xp, w1p, b1p, w2p, b2p)

    return out[:m, :out_features].reshape(*lead_shape, out_features)


def _reference_mlp(x, w1, b1, w2, b2):
    h = jnp.dot(x, w1) + b1
    h = jax.nn.gelu(h, approximate=False)
    return jnp.dot(h, w2) + b2


if __name__ == "__main__":
    # ViT-like small shapes: batch=2, seq=64 (-> 128 tokens), C=128, hidden=256.
    B, N = 2, 64
    in_features, hidden_features, out_features = 128, 256, 128

    key = jax.random.PRNGKey(0)
    kx, k1, kb1, k2, kb2 = jax.random.split(key, 5)

    x = jax.random.normal(kx, (B, N, in_features), dtype=jnp.float32)
    w1 = jax.random.normal(k1, (in_features, hidden_features), jnp.float32) * 0.02
    b1 = jax.random.normal(kb1, (hidden_features,), jnp.float32) * 0.02
    w2 = jax.random.normal(k2, (hidden_features, out_features), jnp.float32) * 0.02
    b2 = jax.random.normal(kb2, (out_features,), jnp.float32) * 0.02

    y_ref = _reference_mlp(x, w1, b1, w2, b2)

    # 1) Default path: bf16 MXU operands + weights-resident 1-D grid.
    y = jax.block_until_ready(mlp_pallas(x, w1, b1, w2, b2))
    assert y.shape == (B, N, out_features)
    assert jnp.allclose(y, y_ref, atol=2e-2, rtol=2e-2), "mismatch (bf16 resident)"

    # 2) Full-f32 operand path, tight tolerance vs reference.
    y32 = jax.block_until_ready(mlp_pallas(x, w1, b1, w2, b2, cast_to_bf16=False))
    assert jnp.allclose(y32, y_ref, atol=1e-4, rtol=1e-4), "mismatch (f32 resident)"

    # 3) Ragged tokens / non-128 widths + forced hidden chunking: exercises the
    #    padded, accumulate-into-o_ref (f32 output, no scratch) chunked path.
    x3 = jax.random.normal(kx, (2, 7, 96), dtype=jnp.float32)
    w1b = jax.random.normal(k1, (96, 200), jnp.float32) * 0.02
    b1b = jax.random.normal(kb1, (200,), jnp.float32) * 0.02
    w2b = jax.random.normal(k2, (200, 96), jnp.float32) * 0.02
    b2b = jax.random.normal(kb2, (96,), jnp.float32) * 0.02
    y3 = jax.block_until_ready(
        mlp_pallas(x3, w1b, b1b, w2b, b2b,
                   block_rows=8, block_hidden=128, cast_to_bf16=False))
    y3_ref = _reference_mlp(x3, w1b, b1b, w2b, b2b)
    assert y3.shape == (2, 7, 96)
    assert jnp.allclose(y3, y3_ref, atol=1e-4, rtol=1e-4), "mismatch (f32 chunked)"

    # 4) bf16 inputs + forced hidden chunking: exercises the f32 scratch accumulator.
    x3b, w1bb, b1bb = x3.astype(jnp.bfloat16), w1b.astype(jnp.bfloat16), b1b.astype(jnp.bfloat16)
    w2bb, b2bb = w2b.astype(jnp.bfloat16), b2b.astype(jnp.bfloat16)
    y4 = jax.block_until_ready(
        mlp_pallas(x3b, w1bb, b1bb, w2bb, b2bb, block_rows=8, block_hidden=128))
    y4_ref = _reference_mlp(x3b.astype(jnp.float32), w1bb.astype(jnp.float32),
                            b1bb.astype(jnp.float32), w2bb.astype(jnp.float32),
                            b2bb.astype(jnp.float32))
    assert y4.shape == (2, 7, 96)
    assert jnp.allclose(y4.astype(jnp.float32), y4_ref, atol=3e-2, rtol=3e-2), \
        "mismatch (bf16 chunked)"

    print("KERNEL_OK")
</pallas_src>

<mosaic_0001>
module attributes {stable_mosaic.version = 11 : i64} {
  func.func @_mlp_kernel_resident(%arg0: i32, %arg1: memref<64x128xbf16, #tpu.memory_space<vmem>>, %arg2: memref<128x256xbf16, #tpu.memory_space<vmem>>, %arg3: memref<1x256xf32, #tpu.memory_space<vmem>>, %arg4: memref<256x128xbf16, #tpu.memory_space<vmem>>, %arg5: memref<1x128xf32, #tpu.memory_space<vmem>>, %arg6: memref<64x128xf32, #tpu.memory_space<vmem>>) attributes {dimension_semantics = [#tpu.dimension_semantics<parallel>], iteration_bounds = array<i64: 2>, scalar_prefetch = 0 : i64, scratch_operands = 0 : i64, tpu.core_type = #tpu.core_type<tc>, window_params = [{transform_indices = @transform_0, window_bounds = array<i64: 64, 128>}, {pipeline_mode = #tpu.pipeline_mode<synchronous>, transform_indices = @transform_1, window_bounds = array<i64: 128, 256>}, {pipeline_mode = #tpu.pipeline_mode<synchronous>, transform_indices = @transform_2, window_bounds = array<i64: 1, 256>}, {pipeline_mode = #tpu.pipeline_mode<synchronous>, transform_indices = @transform_3, window_bounds = array<i64: 256, 128>}, {pipeline_mode = #tpu.pipeline_mode<synchronous>, transform_indices = @transform_4, window_bounds = array<i64: 1, 128>}, {transform_indices = @transform_5, window_bounds = array<i64: 64, 128>}]} {
    %c0 = arith.constant 0 : index
    %c0_0 = arith.constant 0 : index
    %0 = vector.load %arg1[%c0, %c0_0] : memref<64x128xbf16, #tpu.memory_space<vmem>>, vector<64x128xbf16>
    %c0_1 = arith.constant 0 : index
    %c0_2 = arith.constant 0 : index
    %1 = vector.load %arg2[%c0_1, %c0_2] : memref<128x256xbf16, #tpu.memory_space<vmem>>, vector<128x256xbf16>
    %cst = arith.constant dense<0.000000e+00> : vector<64x256xf32>
    %2 = tpu.matmul %0, %1, %cst {dimension_numbers = #tpu.dot_dimension_numbers<[1], [0], [0], [1], [0, 0, 1, 1], [], []>} : vector<64x128xbf16>, vector<128x256xbf16>, vector<64x256xf32> -> vector<64x256xf32>
    %c0_3 = arith.constant 0 : index
    %c0_4 = arith.constant 0 : index
    %3 = vector.load %arg3[%c0_3, %c0_4] : memref<1x256xf32, #tpu.memory_space<vmem>>, vector<1x256xf32>
    %4 = vector.broadcast %3 : vector<1x256xf32> to vector<64x256xf32>
    %5 = arith.addf %2, %4 : vector<64x256xf32>
    %cst_5 = arith.constant 5.000000e-01 : f32
    %6 = vector.broadcast %cst_5 : f32 to vector<64x256xf32>
    %7 = arith.mulf %6, %5 : vector<64x256xf32>
    %cst_6 = arith.constant 0.707106769 : f32
    %8 = vector.broadcast %cst_6 : f32 to vector<64x256xf32>
    %9 = arith.mulf %5, %8 : vector<64x256xf32>
    %10 = math.erf %9 : vector<64x256xf32>
    %cst_7 = arith.constant 1.000000e+00 : f32
    %11 = vector.broadcast %cst_7 : f32 to vector<64x256xf32>
    %12 = arith.addf %11, %10 : vector<64x256xf32>
    %13 = arith.mulf %7, %12 : vector<64x256xf32>
    %14 = arith.truncf %13 : vector<64x256xf32> to vector<64x256xbf16>
    %c0_8 = arith.constant 0 : index
    %c0_9 = arith.constant 0 : index
    %15 = vector.load %arg4[%c0_8, %c0_9] : memref<256x128xbf16, #tpu.memory_space<vmem>>, vector<256x128xbf16>
    %cst_10 = arith.constant dense<0.000000e+00> : vector<64x128xf32>
    %16 = tpu.matmul %14, %15, %cst_10 {dimension_numbers = #tpu.dot_dimension_numbers<[1], [0], [0], [1], [0, 0, 1, 1], [], []>} : vector<64x256xbf16>, vector<256x128xbf16>, vector<64x128xf32> -> vector<64x128xf32>
    %c0_11 = arith.constant 0 : index
    %c0_12 = arith.constant 0 : index
    %17 = vector.load %arg5[%c0_11, %c0_12] : memref<1x128xf32, #tpu.memory_space<vmem>>, vector<1x128xf32>
    %18 = vector.broadcast %17 : vector<1x128xf32> to vector<64x128xf32>
    %19 = arith.addf %16, %18 : vector<64x128xf32>
    %c0_13 = arith.constant 0 : index
    %c0_14 = arith.constant 0 : index
    %20 = vector.load %arg6[%c0_13, %c0_14] : memref<64x128xf32, #tpu.memory_space<vmem>>, vector<64x128xf32>
    tpu.vector_store %arg6[%c0_13, %c0_14], %19 {strides = array<i32>} : memref<64x128xf32, #tpu.memory_space<vmem>>, vector<64x128xf32>,
    return
  }
  func.func @transform_0(%arg0: i32) -> (i32, i32) {
    %c0_i32 = arith.constant 0 : i32
    %c0_i32_0 = arith.constant 0 : i32
    return %arg0, %c0_i32 : i32, i32
  }
  func.func @transform_1(%arg0: i32) -> (i32, i32) {
    %c0_i32 = arith.constant 0 : i32
    %c0_i32_0 = arith.constant 0 : i32
    %c0_i32_1 = arith.constant 0 : i32
    return %c0_i32, %c0_i32_0 : i32, i32
  }
  func.func @transform_2(%arg0: i32) -> (i32, i32) {
    %c0_i32 = arith.constant 0 : i32
    %c0_i32_0 = arith.constant 0 : i32
    %c0_i32_1 = arith.constant 0 : i32
    return %c0_i32, %c0_i32_0 : i32, i32
  }
  func.func @transform_3(%arg0: i32) -> (i32, i32) {
    %c0_i32 = arith.constant 0 : i32
    %c0_i32_0 = arith.constant 0 : i32
    %c0_i32_1 = arith.constant 0 : i32
    return %c0_i32, %c0_i32_0 : i32, i32
  }
  func.func @transform_4(%arg0: i32) -> (i32, i32) {
    %c0_i32 = arith.constant 0 : i32
    %c0_i32_0 = arith.constant 0 : i32
    %c0_i32_1 = arith.constant 0 : i32
    return %c0_i32, %c0_i32_0 : i32, i32
  }
  func.func @transform_5(%arg0: i32) -> (i32, i32) {
    %c0_i32 = arith.constant 0 : i32
    %c0_i32_0 = arith.constant 0 : i32
    return %arg0, %c0_i32 : i32, i32
  }
}

</mosaic_0001>

<bundles_post_ra>
// kernel: mlp_pallas.1
= control target key start
LH: loop header
LB: loop body
LE: loop exit
PB: predicated region body
PF: predicated region fallthrough
CT: control target
= control target key end

     0   :  { %10 = vsyncpa [#allocation3], 0  ;;  %s1386_s0 = inlined_call_operand.vmem [shape: bf16[128,128], index: 0, kind: input, shape index: {}]   ;;  %s1387_s1 = inlined_call_operand.vmem [shape: bf16[128,256], index: 1, kind: input, shape index: {}]   ;;  %s1388_s2 = inlined_call_operand.vmem [shape: f32[1,256], index: 2, kind: input, shape index: {}]   ;;  %s1389_s3 = inlined_call_operand.vmem [shape: bf16[256,128], index: 3, kind: input, shape index: {}]   ;;  %s1390_s4 = inlined_call_operand.vmem [shape: f32[1,128], index: 4, kind: input, shape index: {}]   ;;  %s1391_s5 = inlined_call_operand.hbm [shape: f32[128,128], index: 5, kind: output, shape index: {}]  }
   0x1   :  { %12 = vsyncpa [#allocation3 + $0x1], 0  ;;  %s1116_s18 = smov 0   ;;  %s1118_s19 = smov 0  }
   0x2   :  { %s1120_s20 = smov 0   ;;  %s1122_s21 = smov 0  }
   0x3 LB: > { %s1137_s22 = sadd.s32 4294967295, %s1080_s21   ;;  %s812_s23 = sadd.s32 4294967294, %s1080_s21   ;;  %s1080_s21 = sphi %s1122_s21, %s1397_s21   ;;  %s1076_s20 = sphi %s1120_s20, %s1396_s20   ;;  %s1072_s19 = sphi %s1118_s19, %s1395_s19   ;;  %s1068_s18 = sphi %s1116_s18, %s1394_s18  }
   0x4   : > { %s1141_s24 = sadd.s32 1, %s1080_s21   ;;  %s135_s25 = sadd.s32 1, %s1076_s20 }
   0x5   : > { %s132_s26 = ssub.s32 %s1080_s21, %s1141_s24  ;;  %p145_p0 = scmp.ne.s32.totalorder %s1076_s20, %s1072_s19 }
   0x6   : > { %p133_p1 = scmp.eq.s32.totalorder %s132_s26, 0  ;;  %p146_p2 = scmp.eq.s32.totalorder %s1137_s22, 1 }
   0x7   : > { %p151_p3 = scmp.ne.s32.totalorder %s1072_s19, %s1068_s18  ;;  %p152_p4 = scmp.eq.s32.totalorder %s812_s23, 1 }
   0x8   : > { %s1152_s27 = scalar_select %p133_p1, %s1076_s20, %s135_s25  }
   0x9   : > { %p1154_p5 = por %p146_p2, %p145_p0  ;;  %p1158_p6 = por %p152_p4, %p151_p3 }
   0xa   : > { %p815_p7 = scmp.ge.s32.totalorder %s1080_s21, 1  ;;  %p191_p8 = scmp.lt.s32.totalorder %s1080_s21, 3 }
   0xc   : > { %p192_p9 = pnand %p815_p7, %p191_p8 }
   0xd   : > { %s817_s7 = sshll.u32 (!%p192_p9), %s1137_s22, 3  ;;  %s216_s13 = sand.u32 (!%p192_p9), 1, %s1072_s19  }
   0xe   : > { %195 = sbr.rel (%p192_p9) target bundleno = 518 (0x206), region = 40  ;;  %p220_p10 = scmp.lt.s32.totalorder (!%p192_p9), %s817_s7, 15 }
   0xf   : > { %s816_s14 = sshll.u32 (!%p192_p9), %s216_s13, 6  ;;  %s861_s23 = sshll.u32 (!%p192_p9), %s1137_s22, 10 }
  0x10   : > { %s1325_s17 = scalar_lea.vmem (!%p192_p9), [#allocation2], %s816_s14  ;;  %s1339_s30 = scalar_lea.hbm (!%p192_p9), %s1391_s5, %s861_s23 }
  0x11   : > { %s1346_s6 = scalar_lea.sflag (!%p192_p9), [#allocation3], %s216_s13  ;;  %s1083_s9 = smov (!%p192_p9), [#allocation2]  }
  0x12   : > { %s1024_s10 = sshll.u32 (!%p192_p9), %s1083_s9, 4  ;;  %s1025_s10 = int_to_ptr.vmem [resolvable:$false] %s1024_s10 }
  0x13   : > { %v944_v0 = vld [vmem:[%s1387_s1 + $0x74] ss:$8 sps:$4 sm:$0xff]   ;;  %v946_v1 = vld [vmem:[%s1387_s1 + $0x70] ss:$8 sps:$4 sm:$0xff]   ;;  %v1082_v2 = vmov 0   ;;  %s1399_s7 = smov (!%p220_p10, %s817_s7), 15  ;;  %v253_v37 = vlaneseq }
  0x14   : > { %399 = vmatprep.mubr.bf16.mxu0 %v1082_v2  ;;  %367 = vmatprep.subr.bf16.mxu0 %v944_v0  ;;  %v947_v3 = vld [vmem:[%s1387_s1 + $0x64] ss:$8 sps:$4 sm:$0xff]   ;;  %v949_v4 = vld [vmem:[%s1387_s1 + $0x60] ss:$8 sps:$4 sm:$0xff]   ;;  %v950_v5 = vld [vmem:[%s1387_s1 + $0x54] ss:$8 sps:$4 sm:$0xff]  }
  0x15   : > { %368 = vmatpush1.bf16.msra.mxu0 %v946_v1  ;;  %s818_s16 = sshll.u32 %s1399_s7, 2  ;;  %v952_v6 = vld [vmem:[%s1387_s1 + $0x50] ss:$8 sps:$4 sm:$0xff]   ;;  %v953_v7 = vld [vmem:[%s1387_s1 + $0x44] ss:$8 sps:$4 sm:$0xff]   ;;  %v254_v38 = vshrl.u32 %v253_v37, 7 }
  0x16   : > { %369 = vmatprep.subr.bf16.mxu0 %v947_v3  ;;  %s223_s8 = scalar_lea.vmem %s1386_s0, %s818_s16  ;;  %v955_v8 = vld [vmem:[%s1387_s1 + $0x40] ss:$8 sps:$4 sm:$0xff]   ;;  %v956_v9 = vld [vmem:[%s1387_s1 + $0x34] ss:$8 sps:$4 sm:$0xff]   ;;  %v958_v10 = vld [vmem:[%s1387_s1 + $0x30] ss:$8 sps:$4 sm:$0xff]  }
  0x17   : > { %v959_v11 = vld [vmem:[%s1387_s1 + $0x24] ss:$8 sps:$4 sm:$0xff]   ;;  %v961_v12 = vld [vmem:[%s1387_s1 + $0x20] ss:$8 sps:$4 sm:$0xff]   ;;  %v962_v13 = vld [vmem:[%s1387_s1 + $0x14] ss:$8 sps:$4 sm:$0xff]  }
  0x18   : > { %v964_v14 = vld [vmem:[%s1387_s1 + $0x10] ss:$8 sps:$4 sm:$0xff]   ;;  %v965_v15 = vld [vmem:[%s1387_s1 + $0x4] ss:$8 sps:$4 sm:$0xff]   ;;  %v967_v16 = vld [vmem:[%s1387_s1] ss:$8 sps:$4 sm:$0xff]  }
  0x19   : > { %370 = vmatpush1.bf16.msra.mxu0 %v949_v4  ;;  %v968_v17 = vld [vmem:[%s223_s8] sm:$0xff]   ;;  %v969_v18 = vld [vmem:[%s223_s8 + $0x8] sm:$0xff]   ;;  %v970_v19 = vld [vmem:[%s223_s8 + $0x10] sm:$0xff]   ;;  %v255_v39 = vsub.s32 0, %v254_v38  ;;  %v259_v41 = vsub.s32 1, %v254_v38  ;;  %s1026_s7 = scalar_lea.vmem %s1025_s10, 2048 }
  0x1a   : > { %371 = vmatprep.subr.bf16.mxu0 %v950_v5  ;;  %v971_v20 = vld [vmem:[%s223_s8 + $0x18] sm:$0xff]   ;;  %v974_v23 = vld [vmem:[%s1389_s3 + $0x70] sm:$0xff]   ;;  %v976_v25 = vld [vmem:[%s1389_s3 + $0x68] sm:$0xff]   ;;  %s750_s8 = sshll.u32 %s1325_s17, 4  ;;  %s1341_s8 = int_to_ptr.vmem [resolvable:$true] %s750_s8 }
  0x1b   : > { %v972_v21 = vld [vmem:[%s1389_s3 + $0x78] sm:$0xff]   ;;  %v975_v24 = vld [vmem:[%s1389_s3 + $0x30] sm:$0xff]   ;;  %v977_v26 = vld [vmem:[%s1389_s3 + $0x28] sm:$0xff]   ;;  %s1020_s22 = scalar_lea.vmem %s1341_s8, 1024  ;;  %p1027_p0 = scmp.lt.s32.totalorder %s1341_s8, %s1025_s10 }
  0x1c   : > { %v973_v22 = vld [vmem:[%s1389_s3 + $0x38] sm:$0xff]   ;;  %862 = vmatprep.subr.bf16.mxu1 %v972_v21  ;;  %v978_v27 = vld [vmem:[%s1389_s3 + $0x60] sm:$0xff]   ;;  %v982_v31 = vld [vmem:[%s1389_s3 + $0x50] sm:$0xff]   ;;  %p1021_p11 = scmp.ne.s32.totalorder %s1341_s8, %s1020_s22  ;;  %p1028_p1 = scmp.lt.s32.totalorder %s1026_s7, %s1020_s22 }
  0x1d   : > { %372 = vmatpush1.bf16.msra.mxu0 %v952_v6  ;;  %863 = vmatpush3.bf16.msra.mxu1 %v973_v22  ;;  %v979_v28 = vld [vmem:[%s1389_s3 + $0x20] sm:$0xff]   ;;  %v980_v29 = vld [vmem:[%s1389_s3 + $0x58] sm:$0xff]   ;;  %v983_v32 = vld [vmem:[%s1389_s3 + $0x10] sm:$0xff]  }
  0x1e   : > { %373 = vmatprep.subr.bf16.mxu0 %v953_v7  ;;  %864 = vmatprep.subr.bf16.mxu1 %v974_v23  ;;  %v981_v30 = vld [vmem:[%s1389_s3 + $0x18] sm:$0xff]   ;;  %v984_v33 = vld [vmem:[%s1389_s3 + $0x48] sm:$0xff]   ;;  %v986_v35 = vld [vmem:[%s1389_s3 + $0x40] sm:$0xff]   ;;  %p1022_p12 = pnand %p1021_p11, %p1154_p5  ;;  %p1029_p2 = por %p1028_p1, %p1027_p0 }
  0x1f   : > { %v985_v34 = vld [vmem:[%s1389_s3 + $0x8] sm:$0xff]   ;;  %v987_v36 = vld [vmem:[%s1389_s3] sm:$0xff]  }
  0x20   : > { %v251_v40 = vld [vmem:[%s1388_s2] sm:$0x3]  ;;  %p1023_p13 = pneg %p1022_p12 }
  0x21   : > { %374 = vmatpush1.bf16.msra.mxu0 %v955_v8  ;;  %865 = vmatpush3.bf16.msra.mxu1 %v975_v24  ;;  %v1267_v42 = vrot.slane %v251_v40, %v255_v39  ;;  %v1269_v43 = vrot.slane %v251_v40, %v259_v41 }
  0x22   : > { %375 = vmatprep.subr.bf16.mxu0 %v956_v9  ;;  %866 = vmatprep.subr.bf16.mxu1 %v976_v25  ;;  %p1030_p3 = pnand %p1029_p2, %p1023_p13 }
  0x25   : > { %376 = vmatpush1.bf16.msra.mxu0 %v958_v10  ;;  %867 = vmatpush3.bf16.msra.mxu1 %v977_v26 }
  0x26   : > { %377 = vmatprep.subr.bf16.mxu0 %v959_v11  ;;  %868 = vmatprep.subr.bf16.mxu1 %v978_v27 }
  0x29   : > { %378 = vmatpush1.bf16.msra.mxu0 %v961_v12  ;;  %869 = vmatpush3.bf16.msra.mxu1 %v979_v28 }
  0x2a   : > { %379 = vmatprep.subr.bf16.mxu0 %v962_v13  ;;  %870 = vmatprep.subr.bf16.mxu1 %v980_v29 }
  0x2d   : > { %380 = vmatpush1.bf16.msra.mxu0 %v964_v14  ;;  %871 = vmatpush3.bf16.msra.mxu1 %v981_v30 }
  0x2e   : > { %381 = vmatprep.subr.bf16.mxu0 %v965_v15  ;;  %872 = vmatprep.subr.bf16.mxu1 %v982_v31 }
  0x31   : > { %382 = vmatpush1.bf16.msra.mxu0 %v967_v16  ;;  %873 = vmatpush3.bf16.msra.mxu1 %v983_v32 }
  0x32   : > { %874 = vmatprep.subr.bf16.mxu1 %v984_v33 }
  0x34   : > { %400 = vmatmul.mubr.bf16.vlgmr.msra.gmra.mxu0 %v968_v17 }
  0x35   : > { %409 = vmatprep.mubr.bf16.mxu0 %v1082_v2  ;;  %875 = vmatpush3.bf16.msra.mxu1 %v985_v34 }
  0x36   : > { %876 = vmatprep.subr.bf16.mxu1 %v986_v35 }
  0x39   : > { %877 = vmatpush3.bf16.msra.mxu1 %v987_v36 }
  0x3c   : > { %410 = vmatmul.mubr.bf16.gmra.mxu0 %v969_v18 }
  0x3d   : > { %419 = vmatprep.mubr.bf16.mxu0 %v1082_v2 }
  0x44   : > { %420 = vmatmul.mubr.bf16.gmra.mxu0 %v970_v19 }
  0x45   : > { %429 = vmatprep.mubr.bf16.mxu0 %v1082_v2 }
  0x4c   : > { %430 = vmatmul.mubr.bf16.gmra.mxu0 %v971_v20 }
  0xf4   : > { %v401_v44 = vpop.f32.mrf.mxu0 }
  0xf5   : > { %v402_v45 = vadd.f32 %v401_v44, %v1267_v42 }
  0xf6   : > { %v403_v46 = vpop.f32.mrf.mxu0 }
  0xf7   : > { %v456_v47 = vmul.f32 0.70710677, %v402_v45  ;;  %v404_v48 = vadd.f32 %v403_v46, %v1269_v43  ;;  %v440_v24 = vmul.f32 0.5, %v402_v45 }
  0xf8   : > { %v405_v49 = vpop.f32.mrf.mxu0 }
  0xf9   : > { %v457_v50 = vmul.f32 0.70710677, %v404_v48  ;;  %v406_v51 = vadd.f32 %v405_v49, %v1267_v42  ;;  %988 = verf.f32 %v456_v47  ;;  %v441_v25 = vmul.f32 0.5, %v404_v48 }
  0xfa   : > { %v407_v52 = vpop.f32.mrf.mxu0 }
  0xfb   : > { %v458_v53 = vmul.f32 0.70710677, %v406_v51  ;;  %v408_v54 = vadd.f32 %v407_v52, %v1269_v43  ;;  %990 = verf.f32 %v457_v50  ;;  %v442_v21 = vmul.f32 0.5, %v406_v51 }
  0xfc   : > { %v411_v55 = vpop.f32.mrf.mxu0 }
  0xfd   : > { %992 = verf.f32 %v458_v53  ;;  %v459_v56 = vmul.f32 0.70710677, %v408_v54  ;;  %v1276_v57 = vadd.f32 %v411_v55, %v1267_v42  ;;  %v443_v28 = vmul.f32 0.5, %v408_v54 }
  0xfe   : > { %v413_v58 = vpop.f32.mrf.mxu0 }
  0xff   : > { %994 = verf.f32 %v459_v56  ;;  %v1279_v59 = vadd.f32 %v413_v58, %v1269_v43  ;;  %v460_v60 = vmul.f32 0.70710677, %v1276_v57 }
 0x100   : > { %v415_v61 = vpop.f32.mrf.mxu0 }
 0x101   : > { %v461_v62 = vmul.f32 0.70710677, %v1279_v59  ;;  %v416_v63 = vadd.f32 %v415_v61, %v1267_v42  ;;  %v445_v52 = vmul.f32 0.5, %v1279_v59 }
 0x102   : > { %v417_v0 = vpop.f32.mrf.mxu0 }
 0x103   : > { %996 = verf.f32 %v461_v62  ;;  %v462_v1 = vmul.f32 0.70710677, %v416_v63  ;;  %v418_v2 = vadd.f32 %v417_v0, %v1269_v43  ;;  %v446_v53 = vmul.f32 0.5, %v416_v63 }
 0x104   : > { %998 = verf.f32 %v460_v60  ;;  %v421_v3 = vpop.f32.mrf.mxu0 }
 0x105   : > { %1000 = verf.f32 %v462_v1  ;;  %v463_v4 = vmul.f32 0.70710677, %v418_v2  ;;  %v1286_v5 = vadd.f32 %v421_v3, %v1267_v42  ;;  %v447_v54 = vmul.f32 0.5, %v418_v2 }
 0x106   : > { %v423_v6 = vpop.f32.mrf.mxu0  ;;  %v989_v8 = vpop.eup %988 }
 0x107   : > { %1002 = verf.f32 %v463_v4  ;;  %v464_v7 = vmul.f32 0.70710677, %v1286_v5  ;;  %v1290_v9 = vadd.f32 %v423_v6, %v1269_v43  ;;  %v488_v20 = vadd.f32 1.0, %v989_v8 }
 0x108   : > { %v425_v10 = vpop.f32.mrf.mxu0  ;;  %v991_v11 = vpop.eup %990 }
 0x109   : > { %v1293_v12 = vadd.f32 %v425_v10, %v1267_v42  ;;  %v465_v14 = vmul.f32 0.70710677, %v1290_v9  ;;  %1004 = verf.f32 %v464_v7  ;;  %v489_v23 = vadd.f32 1.0, %v991_v11 }
 0x10a   : > { %v993_v13 = vpop.eup %992  ;;  %v427_v15 = vpop.f32.mrf.mxu0  ;;  %v504_v34 = vmul.f32 %v488_v20, %v440_v24  ;;  %v449_v8 = vmul.f32 0.5, %v1290_v9 }
 0x10b   : > { %v490_v16 = vadd.f32 1.0, %v993_v13  ;;  %v466_v17 = vmul.f32 0.70710677, %v1293_v12  ;;  %v1298_v18 = vadd.f32 %v427_v15, %v1269_v43  ;;  %1006 = verf.f32 %v465_v14 }
 0x10c   : > { %v995_v19 = vpop.eup %994  ;;  %v431_v22 = vpop.f32.mrf.mxu0  ;;  %v505_v36 = vmul.f32 %v489_v23, %v441_v25  ;;  %v448_v14 = vmul.f32 0.5, %v1286_v5 }
 0x10d   : > { %1008 = verf.f32 %v466_v17  ;;  %v467_v26 = vmul.f32 0.70710677, %v1298_v18  ;;  %v506_v27 = vmul.f32 %v490_v16, %v442_v21  ;;  %v1302_v29 = vadd.f32 %v431_v22, %v1267_v42 }
 0x10e   : > { %v433_v30 = vpop.f32.mrf.mxu0  ;;  %v491_v31 = vadd.f32 1.0, %v995_v19  ;;  %v451_v11 = vmul.f32 0.5, %v1298_v18 }
 0x10f   : > { %1010 = verf.f32 %v467_v26  ;;  %v1305_v32 = vadd.f32 %v433_v30, %v1269_v43  ;;  %v468_v39 = vmul.f32 0.70710677, %v1302_v29  ;;  %v520_v47 = vpack.c.bf16 %v506_v27, %v504_v34 }
 0x110   : > { %v997_v33 = vpop.eup %996  ;;  %v435_v35 = vpop.f32.mrf.mxu0  ;;  %v507_v37 = vmul.f32 %v491_v31, %v443_v28  ;;  %v452_v30 = vmul.f32 0.5, %v1302_v29 }
 0x111   : > { %v999_v38 = vpop.eup %998  ;;  %v469_v40 = vmul.f32 0.70710677, %v1305_v32  ;;  %v436_v44 = vadd.f32 %v435_v35, %v1267_v42  ;;  %v493_v48 = vadd.f32 1.0, %v997_v33  ;;  %v444_v42 = vmul.f32 0.5, %v1276_v57 }
 0x112   : > { %v1001_v41 = vpop.eup %1000  ;;  %v437_v45 = vpop.f32.mrf.mxu0  ;;  %v521_v46 = vpack.c.bf16 %v507_v37, %v505_v36  ;;  %v492_v56 = vadd.f32 1.0, %v999_v38  ;;  %v450_v57 = vmul.f32 0.5, %v1293_v12  ;;  %v453_v12 = vmul.f32 0.5, %v1305_v32  ;;  %v839_v38 = vld [vmem:[%s1390_s4] ss:$0 sm:$0xff] }
 0x113   : > { %v494_v49 = vadd.f32 1.0, %v1001_v41  ;;  %1012 = verf.f32 %v469_v40  ;;  %v438_v50 = vadd.f32 %v437_v45, %v1269_v43  ;;  %v470_v55 = vmul.f32 0.70710677, %v436_v44 }
 0x114   : > { %v1003_v51 = vpop.eup %1002  ;;  %695 = vmatprep.mubr.bf16.mxu1 %v521_v46  ;;  %1014 = verf.f32 %v468_v39  ;;  %v509_v61 = vmul.f32 %v493_v48, %v445_v52  ;;  %v508_v3 = vmul.f32 %v492_v56, %v444_v42  ;;  %v454_v27 = vmul.f32 0.5, %v436_v44 }
 0x115   : > { %v495_v58 = vadd.f32 1.0, %v1003_v51  ;;  %v471_v60 = vmul.f32 0.70710677, %v438_v50  ;;  %696 = vmatmul.mubr.bf16.vlgmr.msra.gmra.mxu1 %v520_v47  ;;  %1016 = verf.f32 %v470_v55  ;;  %v510_v62 = vmul.f32 %v494_v49, %v446_v53 }
 0x116   : > { %v1005_v43 = vpop.eup %1004  ;;  %v455_v5 = vmul.f32 0.5, %v438_v50 }
 0x117   : > { %v511_v0 = vmul.f32 %v495_v58, %v447_v54  ;;  %1018 = verf.f32 %v471_v60  ;;  %v522_v6 = vpack.c.bf16 %v510_v62, %v508_v3  ;;  %v496_v10 = vadd.f32 1.0, %v1005_v43 }
 0x118   : > { %v1007_v1 = vpop.eup %1006 }
 0x119   : > { %v523_v59 = vpack.c.bf16 %v511_v0, %v509_v61  ;;  %v497_v2 = vadd.f32 1.0, %v1007_v1  ;;  %v512_v20 = vmul.f32 %v496_v10, %v448_v14 }
 0x11a   : > { %v1009_v63 = vpop.eup %1008 }
 0x11b   : > { %v498_v4 = vadd.f32 1.0, %v1009_v63  ;;  %703 = vmatprep.mubr.bf16.mxu1 %v523_v59  ;;  %v513_v15 = vmul.f32 %v497_v2, %v449_v8 }
 0x11c   : > { %v1011_v7 = vpop.eup %1010 }
 0x11d   : > { %v499_v13 = vadd.f32 1.0, %v1011_v7  ;;  %704 = vmatmul.mubr.bf16.gmra.mxu1 %v522_v6  ;;  %v514_v16 = vmul.f32 %v498_v4, %v450_v57 }
 0x11f   : > { %v515_v17 = vmul.f32 %v499_v13, %v451_v11  ;;  %v524_v9 = vpack.c.bf16 %v514_v16, %v512_v20 }
 0x120   : > { %v1013_v19 = vpop.eup %1012 }
 0x121   : > { %v525_v21 = vpack.c.bf16 %v515_v17, %v513_v15  ;;  %v1015_v22 = vpop.eup %1014  ;;  %v501_v24 = vadd.f32 1.0, %v1013_v19 }
 0x122   : > { %v1017_v23 = vpop.eup %1016  ;;  %v500_v26 = vadd.f32 1.0, %v1015_v22 }
 0x123   : > { %711 = vmatprep.mubr.bf16.mxu1 %v525_v21  ;;  %v502_v18 = vadd.f32 1.0, %v1017_v23  ;;  %v517_v31 = vmul.f32 %v501_v24, %v453_v12 }
 0x124   : > { %v1019_v25 = vpop.eup %1018  ;;  %v516_v35 = vmul.f32 %v500_v26, %v452_v30 }
 0x125   : > { %v503_v28 = vadd.f32 1.0, %v1019_v25  ;;  %712 = vmatmul.mubr.bf16.gmra.mxu1 %v524_v9  ;;  %v518_v33 = vmul.f32 %v502_v18, %v454_v27 }
 0x127   : > { %v519_v34 = vmul.f32 %v503_v28, %v455_v5  ;;  %v526_v37 = vpack.c.bf16 %v518_v33, %v516_v35 }
 0x129   : > { %v527_v36 = vpack.c.bf16 %v519_v34, %v517_v31 }
 0x12b   : > { %719 = vmatprep.mubr.bf16.mxu1 %v527_v36 }
 0x12d   : > { %720 = vmatmul.mubr.bf16.gmra.mxu1 %v526_v37 }
 0x1d5   : > { %v878_v32 = vpop.f32.mrf.mxu1 }
 0x1d7   : > { %v879_v39 = vpop.f32.mrf.mxu1 }
 0x1d8   : > { %v880_v40 = vadd.f32 %v879_v39, %v878_v32 }
 0x1d9   : > { %v881_v41 = vpop.f32.mrf.mxu1 }
 0x1da   : > { %v698_v29 = vadd.f32 %v880_v40, %v839_v38 }
 0x1db   : > { %v882_v44 = vpop.f32.mrf.mxu1 }
 0x1dc   : > { %728 = vst [vmem:[%s1325_s17] sm:$0xff] %v698_v29  ;;  %v883_v45 = vadd.f32 %v882_v44, %v881_v41 }
 0x1dd   : > { %v884_v46 = vpop.f32.mrf.mxu1 }
 0x1de   : > { %v701_v47 = vadd.f32 %v883_v45, %v839_v38 }
 0x1df   : > { %v885_v48 = vpop.f32.mrf.mxu1 }
 0x1e0   : > { %729 = vst [vmem:[%s1325_s17 + $0x8] sm:$0xff] %v701_v47  ;;  %v886_v49 = vadd.f32 %v885_v48, %v884_v46 }
 0x1e1   : > { %v887_v50 = vpop.f32.mrf.mxu1 }
 0x1e2   : > { %v706_v51 = vadd.f32 %v886_v49, %v839_v38 }
 0x1e3   : > { %v888_v52 = vpop.f32.mrf.mxu1 }
 0x1e4   : > { %730 = vst [vmem:[%s1325_s17 + $0x10] sm:$0xff] %v706_v51  ;;  %v889_v53 = vadd.f32 %v888_v52, %v887_v50 }
 0x1e5   : > { %v890_v54 = vpop.f32.mrf.mxu1 }
 0x1e6   : > { %v709_v55 = vadd.f32 %v889_v53, %v839_v38 }
 0x1e7   : > { %v891_v56 = vpop.f32.mrf.mxu1 }
 0x1e8   : > { %731 = vst [vmem:[%s1325_s17 + $0x18] sm:$0xff] %v709_v55  ;;  %v892_v58 = vadd.f32 %v891_v56, %v890_v54 }
 0x1e9   : > { %v893_v60 = vpop.f32.mrf.mxu1 }
 0x1ea   : > { %v714_v42 = vadd.f32 %v892_v58, %v839_v38 }
 0x1eb   : > { %v894_v61 = vpop.f32.mrf.mxu1 }
 0x1ec   : > { %732 = vst [vmem:[%s1325_s17 + $0x20] sm:$0xff] %v714_v42  ;;  %v895_v62 = vadd.f32 %v894_v61, %v893_v60 }
 0x1ed   : > { %v896_v0 = vpop.f32.mrf.mxu1 }
 0x1ee   : > { %v717_v43 = vadd.f32 %v895_v62, %v839_v38 }
 0x1ef   : > { %v897_v1 = vpop.f32.mrf.mxu1 }
 0x1f0   : > { %733 = vst [vmem:[%s1325_s17 + $0x28] sm:$0xff] %v717_v43  ;;  %v898_v3 = vadd.f32 %v897_v1, %v896_v0 }
 0x1f1   : > { %v899_v59 = vpop.f32.mrf.mxu1 }
 0x1f2   : > { %v722_v63 = vadd.f32 %v898_v3, %v839_v38 }
 0x1f3   : > { %v900_v2 = vpop.f32.mrf.mxu1 }
 0x1f4   : > { %734 = vst [vmem:[%s1325_s17 + $0x30] sm:$0xff] %v722_v63  ;;  %v901_v4 = vadd.f32 %v900_v2, %v899_v59 }
 0x1f6   : > { %v725_v6 = vadd.f32 %v901_v4, %v839_v38 }
 0x1f8   : > { %735 = vst [vmem:[%s1325_s17 + $0x38] sm:$0xff] %v725_v6 }
 0x1f9   : > { %1033 = shalt.err (!%p1030_p3)
}
 0x1fa   : > { %s1034_s11 = scalar_lea.hbm %s1339_s30, 1024  ;;  %s1038_s14 = scalar_lea.hbm %s1391_s5, 2048 }
 0x1fb   : > { %p1035_p4 = scmp.ne.s32.totalorder %s1339_s30, %s1034_s11  ;;  %p1039_p9 = scmp.lt.s32.totalorder %s1339_s30, %s1391_s5 }
 0x1fc   : > { %p1040_p10 = scmp.lt.s32.totalorder %s1038_s14, %s1034_s11 }
 0x1fd   : > { %p1036_p7 = pnand %p1035_p4, %p1154_p5 }
 0x1fe   : > { %p1041_p11 = por %p1040_p10, %p1039_p9 }
 0x1ff   : > { %p1037_p8 = pneg %p1036_p7 }
 0x201   : > { %p1042_p12 = pnand %p1041_p11, %p1037_p8 }
 0x203   : > { %1045 = shalt.err (!%p1042_p12)
}
 0x204   : > { %s1084_s17 = smov 128   ;;  %s1085_s23 = smov 8  }
 0x205   : > { %902 = dma.vmem_to_hbm [thread:$0]  (%p1154_p5), %s1341_s8, 1024, %s1339_s30, %s1346_s6, %s1084_s17, %s1084_s17, %s1085_s23  }
 0x206 PF: > { %p908_p13 = scmp.ge.s32.totalorder %s1080_s21, 2  ;;  %s765_s25 = sand.u32 1, %s1068_s18  }
 0x207   : > { %s766_s26 = scalar_lea.sflag [#allocation3], %s765_s25 }
 0x208   : > { %p905_p0 = pnand %p908_p13, %p1158_p6 }
 0x20a   : > { %p906_p1 = pneg %p905_p0 }
 0x20c   : > { %1063 = dma.done.wait (%p906_p1), %s766_s26, 1024  }
 0x20d   : > { %1065 = vsyncadd (%p906_p1), %s766_s26, 4294966272  ;;  %p15_p2 = scmp.ge.s32.totalorder %s1141_s24, 4   ;;  %s1394_s18 = smov %s1072_s19 }
 0x20e   : > { %s1395_s19 = smov %s1076_s20  ;;  %s1396_s20 = smov %s1152_s27 }
 0x20f   : > { %s1397_s21 = smov %s1141_s24  ;;  %17 = sbr.rel (!%p15_p2) target bundleno = 3 (0x3), region = 75 }
 0x214   :  { %771 = vsyncpa [#allocation3], 1 }
 0x215   :  { %773 = vsyncpa [#allocation3 + $0x1], 1 }

</bundles_post_ra>
